<compile_context>
chip_gen: v6e
topology: v6e:2x2x1
jax: 0.10.0
libtpu: 0.0.40
codegen_flags: <defaults>
</compile_context>

<pallas_src>
import functools
import math

import jax
import jax.numpy as jnp
from jax.experimental import pallas as pl
from jax.experimental.pallas import tpu as pltpu


_TARGET_BLOCK_ELEMS = 256 * 1024   # ~1 MiB of f32 per x/out block


def build_pe(d_model: int, max_len: int, dtype=jnp.float32) -> jnp.ndarray:
    """Deterministic sinusoidal positional-encoding buffer, shape [max_len, d_model]."""
    assert d_model % 2 == 0, "SinusoidalEncoding requires an even d_model"
    position = jnp.arange(max_len, dtype=jnp.float32)[:, None]
    div_term = jnp.exp(
        jnp.arange(0, d_model, 2, dtype=jnp.float32) * (-math.log(10000.0) / d_model)
    )
    pe = jnp.zeros((max_len, d_model), dtype=jnp.float32)
    pe = pe.at[:, 0::2].set(jnp.sin(position * div_term))
    pe = pe.at[:, 1::2].set(jnp.cos(position * div_term))
    return pe.astype(dtype)


def _add_pe_kernel(x_ref, pe_ref, o_ref):
    # x block: (BB, S_tile, D); pe block: (S_tile, D) broadcast over the batch rows.
    o_ref[...] = x_ref[...] + pe_ref[...][None, :, :]


def _add_pe_dropout_kernel(x_ref, pe_ref, bits_ref, o_ref, *, threshold, scale):
    # Fused training-mode dropout.  keep iff (bits & 0xFFFFFF) >= round(rate * 2^24),
    # so P(keep) = 1 - rate; integer compare only (no int->float convert per element).
    y = x_ref[...] + pe_ref[...][None, :, :]
    u24 = jnp.bitwise_and(bits_ref[...], jnp.uint32(0x00FFFFFF))
    keep = u24 >= jnp.uint32(threshold)
    scaled = y * jnp.asarray(scale, dtype=y.dtype)
    o_ref[...] = jnp.where(keep, scaled, jnp.zeros_like(scaled))


def sinusoidal_encoding_forward(
    x: jnp.ndarray,
    pe: jnp.ndarray,
    *,
    dropout_rate: float = 0.1,
    deterministic: bool = True,
    rng_key=None,
) -> jnp.ndarray:
    """
    x:  [batch, seq_len, d_model]
    pe: [max_len, d_model]  (only the first seq_len rows are used)
    """
    B, S, D = x.shape
    max_len, d_model = pe.shape
    assert d_model == D, f"pe d_model {d_model} != x d_model {D}"
    assert S <= max_len, f"seq_len {S} exceeds max_len {max_len}"

    pe = pe.astype(x.dtype)

    # ---- block geometry: (BB, S_tile, D) blocks on the unmodified (B, S, D) array ----
    s_cap = max(1, _TARGET_BLOCK_ELEMS // D)
    if S <= s_cap:
        s_tile = S                                  # full seq dim (always legal)
    else:
        s_tile = max(8, (s_cap // 8) * 8)           # sublane-dense multiple of 8
    bb = max(1, min(B, _TARGET_BLOCK_ELEMS // max(1, s_tile * D)))

    num_s = pl.cdiv(S, s_tile)
    num_b = pl.cdiv(B, bb)
    grid = (num_s, num_b)   # batch innermost -> the pe block stays resident across it

    # ---- pe buffer: keep the full registered buffer (no copy) whenever legal ----
    # pe's block first-dim must be a multiple of 8 or equal pe's full first dim, and
    # the windowed rows must exist; slice/pad only in the rare cases that need it.
    n_rows = num_s * s_tile
    if (s_tile % 8 != 0 and s_tile != max_len) or n_rows > max_len:
        if n_rows <= max_len:
            pe_used = jax.lax.slice(pe, (0, 0), (n_rows, D))
        else:  # S == max_len and S % s_tile != 0: pad a partial last tile
            pad = n_rows - max_len
            pe_used = jnp.concatenate([pe, jnp.zeros((pad, D), pe.dtype)], axis=0)
    else:
        pe_used = pe

    x_spec = pl.BlockSpec((bb, s_tile, D), lambda i, b: (b, i, 0))
    pe_spec = pl.BlockSpec((s_tile, D), lambda i, b: (i, 0))
    out_spec = pl.BlockSpec((bb, s_tile, D), lambda i, b: (b, i, 0))
    out_shape = jax.ShapeDtypeStruct((B, S, D), x.dtype)
    compiler_params = pltpu.CompilerParams(
        dimension_semantics=("parallel", "parallel"),
    )

    use_dropout = (not deterministic) and dropout_rate > 0.0

    if not use_dropout:
        return pl.pallas_call(
            _add_pe_kernel,
            out_shape=out_shape,
            grid=grid,
            in_specs=[x_spec, pe_spec],
            out_specs=out_spec,
            compiler_params=compiler_params,
        )(x, pe_used)

    if rng_key is None:
        rng_key = jax.random.PRNGKey(0)
    # Random bits generated outside the kernel (portable to interpret mode and TPU),
    # consumed in-kernel with an integer threshold compare.
    bits = jax.random.bits(rng_key, (B, S, D), dtype=jnp.uint32)
    threshold = min(int(round(float(dropout_rate) * (1 << 24))), (1 << 24) - 1)
    scale = 1.0 / (1.0 - float(dropout_rate))
    kernel = functools.partial(_add_pe_dropout_kernel, threshold=threshold, scale=scale)

    return pl.pallas_call(
        kernel,
        out_shape=out_shape,
        grid=grid,
        in_specs=[x_spec, pe_spec, x_spec],   # bits tiled exactly like x
        out_specs=out_spec,
        compiler_params=compiler_params,
    )(x, pe_used, bits)


if __name__ == "__main__":
    # Small shapes consistent with the module's forward: [batch, seq_len, d_model]
    B, S, D = 2, 8, 32
    MAX_LEN = 64  # module default is 5000; a smaller deterministic buffer suffices here

    key = jax.random.PRNGKey(0)
    k_x, k_drop = jax.random.split(key)
    x = jax.random.normal(k_x, (B, S, D), dtype=jnp.float32)
    pe = build_pe(D, MAX_LEN)

    ref = x + pe[:S][None, :, :]

    # Eval mode (dropout = identity): exact match against the reference.
    out = sinusoidal_encoding_forward(x, pe, deterministic=True)
    out = jax.block_until_ready(out)
    assert out.shape == (B, S, D)
    assert jnp.allclose(out, ref, atol=1e-6, rtol=1e-6)

    # Training mode (fused dropout): every element must be either 0 (dropped) or
    # (x + pe) / (1 - p) (kept), and most elements should be kept.
    p = 0.1
    out_tr = sinusoidal_encoding_forward(
        x, pe, dropout_rate=p, deterministic=False, rng_key=k_drop
    )
    out_tr = jax.block_until_ready(out_tr)
    scaled = ref / (1.0 - p)
    dropped = jnp.abs(out_tr) <= 1e-6
    kept = jnp.abs(out_tr - scaled) <= 1e-4 * (1.0 + jnp.abs(scaled))
    assert bool(jnp.all(dropped | kept))
    assert float(jnp.mean(kept.astype(jnp.float32))) > 0.5  # ~90% expected to be kept

    print("KERNEL_OK")
</pallas_src>

<mosaic_0001>
module attributes {stable_mosaic.version = 11 : i64} {
  func.func @_add_pe_kernel(%arg0: i32, %arg1: i32, %arg2: memref<2x8x32xf32, #tpu.memory_space<vmem>>, %arg3: memref<8x32xf32, #tpu.memory_space<vmem>>, %arg4: memref<2x8x32xf32, #tpu.memory_space<vmem>>) attributes {dimension_semantics = [#tpu.dimension_semantics<parallel>, #tpu.dimension_semantics<parallel>], iteration_bounds = array<i64: 1, 1>, scalar_prefetch = 0 : i64, scratch_operands = 0 : i64, tpu.core_type = #tpu.core_type<tc>, window_params = [{transform_indices = @transform_0, window_bounds = array<i64: 2, 8, 32>}, {transform_indices = @transform_1, window_bounds = array<i64: 8, 32>}, {transform_indices = @transform_2, window_bounds = array<i64: 2, 8, 32>}]} {
    %c0 = arith.constant 0 : index
    %c0_0 = arith.constant 0 : index
    %c0_1 = arith.constant 0 : index
    %0 = vector.load %arg2[%c0, %c0_0, %c0_1] : memref<2x8x32xf32, #tpu.memory_space<vmem>>, vector<2x8x32xf32>
    %c0_2 = arith.constant 0 : index
    %c0_3 = arith.constant 0 : index
    %1 = vector.load %arg3[%c0_2, %c0_3] : memref<8x32xf32, #tpu.memory_space<vmem>>, vector<8x32xf32>
    %2 = vector.shape_cast %1 : vector<8x32xf32> to vector<1x8x32xf32>
    %3 = vector.broadcast %2 : vector<1x8x32xf32> to vector<2x8x32xf32>
    %4 = arith.addf %0, %3 : vector<2x8x32xf32>
    %c0_4 = arith.constant 0 : index
    %c0_5 = arith.constant 0 : index
    %c0_6 = arith.constant 0 : index
    %5 = vector.load %arg4[%c0_4, %c0_5, %c0_6] : memref<2x8x32xf32, #tpu.memory_space<vmem>>, vector<2x8x32xf32>
    tpu.vector_store %arg4[%c0_4, %c0_5, %c0_6], %4 {strides = array<i32>} : memref<2x8x32xf32, #tpu.memory_space<vmem>>, vector<2x8x32xf32>,
    return
  }
  func.func @transform_0(%arg0: i32, %arg1: i32) -> (i32, i32, i32) {
    %c0_i32 = arith.constant 0 : i32
    %c0_i32_0 = arith.constant 0 : i32
    return %arg1, %arg0, %c0_i32 : i32, i32, i32
  }
  func.func @transform_1(%arg0: i32, %arg1: i32) -> (i32, i32) {
    %c0_i32 = arith.constant 0 : i32
    %c0_i32_0 = arith.constant 0 : i32
    return %arg0, %c0_i32 : i32, i32
  }
  func.func @transform_2(%arg0: i32, %arg1: i32) -> (i32, i32, i32) {
    %c0_i32 = arith.constant 0 : i32
    %c0_i32_0 = arith.constant 0 : i32
    return %arg1, %arg0, %c0_i32 : i32, i32, i32
  }
}

</mosaic_0001>

<bundles_post_ra>
// kernel: tpu_custom_call.1
= control target key start
LH: loop header
LB: loop body
LE: loop exit
PB: predicated region body
PF: predicated region fallthrough
CT: control target
= control target key end

     0   :  { %vm17_vm0 = vcmask 261120   ;;  %s91_s0 = inlined_call_operand.vmem [shape: f32[2,8,32], index: 0, kind: input, shape index: {}]   ;;  %s92_s1 = inlined_call_operand.vmem [shape: f32[64,32], index: 1, kind: input, shape index: {}]   ;;  %s93_s2 = inlined_call_operand.hbm [shape: f32[2,8,32], index: 2, kind: output, shape index: {}]  }
   0x1   :  { %v12_v0 = vld [vmem:[%s91_s0] sm:$0xff]  ;;  %v13_v2 = vld [vmem:[%s91_s0 + $0x8] sm:$0xff] }
   0x2   :  { %v14_v1 = vld [vmem:[%s92_s1] sm:$0xff] }
   0x3   :  { %v15_v3 = vadd.f32 %v14_v1, %v12_v0  ;;  %v16_v4 = vadd.f32 %v14_v1, %v13_v2 }
   0x4   :  { %7 = vsyncpa [#allocation3], 0  ;;  %s61_s15 = smov [#allocation2]  }
   0x5   :  { %s25_s16 = sshll.u32 %s61_s15, 4  ;;  %18 = vst.msk [vmem:[#allocation2] sm:$0xff] %vm17_vm0, %v15_v3  ;;  %19 = vst.msk [vmem:[#allocation2 + $0x8] sm:$0xff] %vm17_vm0, %v16_v4  ;;  %s26_s16 = int_to_ptr.vmem [resolvable:$true] %s25_s16 }
   0x6   :  { %s39_s17 = scalar_lea.vmem %s26_s16, 256  ;;  %p44_p1 = scmp.lt.s32.totalorder %s26_s16, %s26_s16 }
   0x7   :  { %p40_p0 = scmp.ne.s32.totalorder %s26_s16, %s39_s17  ;;  %p45_p2 = scmp.lt.s32.totalorder %s39_s17, %s39_s17 }
   0x9   :  { %p46_p3 = por %p45_p2, %p44_p1 }
   0xb   :  { %p47_p4 = pnand %p46_p3, %p40_p0 }
   0xd   :  { %50 = shalt.err (!%p47_p4)
}
   0xe   :  { %s62_s1 = smov 128   ;;  %s63_s18 = smov 8  }
   0xf   :  { %31 = dma.vmem_to_hbm [thread:$0]  %s26_s16, 256, %s93_s2, [#allocation3], %s62_s1, %s62_s1, %s63_s18  }
  0x10   :  { %59 = dma.done.wait [#allocation3], 256  }
  0x11   :  { %60 = vsyncadd [#allocation3], 4294967040 }
  0x12   :  { %35 = vsyncpa [#allocation3], 1 }

</bundles_post_ra>
